<compile_context>
chip_gen: v6e
topology: v6e:2x2x1
jax: 0.10.0
libtpu: 0.0.40
codegen_flags: <defaults>
</compile_context>

<pallas_src>
import functools

import jax
import jax.numpy as jnp
from jax.experimental import pallas as pl
from jax.experimental.pallas import tpu as pltpu


def _gln_kernel(x_ref, g_ref, b_ref, o_ref, sum_ref, sq_ref, *,
                inv_n, f_total, tf, needs_mask, eps):
    p = pl.program_id(1)   # phase: 0 = accumulate stats, 1 = normalize + write
    fi = pl.program_id(2)  # F-tile index

    @pl.when((p == 0) & (fi == 0))
    def _():
        sum_ref[...] = jnp.zeros_like(sum_ref)
        sq_ref[...] = jnp.zeros_like(sq_ref)

    x = x_ref[0].astype(jnp.float32)                      # (C, TF)

    @pl.when(p == 0)
    def _():
        if needs_mask:
            lane = jax.lax.broadcasted_iota(jnp.int32, x.shape, 1)
            valid = (fi * tf + lane) < f_total
            xm = jnp.where(valid, x, 0.0)
        else:
            xm = x
        sum_ref[...] += jnp.sum(xm, keepdims=True)         # (1, 1)
        sq_ref[...] += jnp.sum(xm * xm, keepdims=True)     # (1, 1)

    @pl.when(p == 1)
    def _():
        mean = sum_ref[...] * inv_n                        # (1, 1)
        var = sq_ref[...] * inv_n - mean * mean            # biased variance
        inv = jax.lax.rsqrt(var + eps)
        y = (x - mean) * inv
        y = y * g_ref[...].astype(jnp.float32) + b_ref[...].astype(jnp.float32)
        o_ref[0] = y.astype(o_ref.dtype)


def _choose_tf(F, C, dtype_bytes, per_buffer_budget=2 * 1024 * 1024):
    # Whole-F block if it fits the per-buffer budget (always layout-legal).
    if C * F * dtype_bytes <= per_buffer_budget or F <= 128:
        return int(F)
    tf = (per_buffer_budget // (C * dtype_bytes)) // 128 * 128
    return int(max(128, min(tf, F)))


def global_layer_norm(x, gamma, beta, *, eps=1e-5, tf=None):
    """x: (B, C, F); gamma, beta: (C,). Returns (B, C, F) = gLN(x)."""
    B, C, F = x.shape
    dtype_bytes = jnp.dtype(x.dtype).itemsize
    TF = int(tf) if tf is not None else _choose_tf(F, C, dtype_bytes)
    nF = pl.cdiv(F, TF)
    needs_mask = (F % TF) != 0

    gamma2d = gamma.reshape(C, 1)
    beta2d = beta.reshape(C, 1)

    kernel = functools.partial(
        _gln_kernel,
        inv_n=1.0 / float(C * F),
        f_total=F,
        tf=TF,
        needs_mask=needs_mask,
        eps=float(eps),
    )

    x_read_bytes = (1 if nF == 1 else 2) * B * C * F * dtype_bytes
    cost = pl.CostEstimate(
        flops=8 * B * C * F,
        transcendentals=B,
        bytes_accessed=x_read_bytes + B * C * F * dtype_bytes + 2 * C * 4,
    )

    return pl.pallas_call(
        kernel,
        out_shape=jax.ShapeDtypeStruct((B, C, F), x.dtype),
        grid_spec=pltpu.PrefetchScalarGridSpec(
            num_scalar_prefetch=0,
            grid=(B, 2, nF),
            in_specs=[
                pl.BlockSpec((1, C, TF), lambda b, p, f: (b, 0, f)),
                pl.BlockSpec((C, 1), lambda b, p, f: (0, 0)),   # gamma: resident
                pl.BlockSpec((C, 1), lambda b, p, f: (0, 0)),   # beta:  resident
            ],
            # Phase 0 parks the output window on block (b, 0, 0), which phase 1
            # writes first -> no junk write-backs, lane-dense stores only.
            out_specs=pl.BlockSpec((1, C, TF), lambda b, p, f: (b, 0, p * f)),
            scratch_shapes=[pltpu.VMEM((1, 1), jnp.float32),
                            pltpu.VMEM((1, 1), jnp.float32)],
        ),
        compiler_params=pltpu.CompilerParams(
            dimension_semantics=("parallel", "arbitrary", "arbitrary")),
        cost_estimate=cost,
    )(x, gamma2d, beta2d)


def global_layer_norm_ref(x, gamma, beta, eps=1e-5):
    # Pure-JAX reference mirroring the PyTorch forward exactly.
    xf = x.astype(jnp.float32)
    mean = jnp.mean(xf, axis=(-2, -1), keepdims=True)
    var = jnp.mean((xf - mean) ** 2, axis=(-2, -1), keepdims=True)  # unbiased=False
    y = (xf - mean) / jnp.sqrt(var + eps)
    y = y * gamma[None, :, None] + beta[None, :, None]
    return y.astype(x.dtype)


if __name__ == "__main__":
    key = jax.random.PRNGKey(0)
    k1, k2 = jax.random.split(key)

    # Small shape consistent with the module's (batch, channels, features) layout.
    B, C, F = 2, 4, 16
    x = jax.random.normal(k1, (B, C, F), dtype=jnp.float32)
    gamma = jnp.ones((C,), jnp.float32) + 0.1 * jnp.arange(C, dtype=jnp.float32)
    beta = 0.05 * jnp.arange(C, dtype=jnp.float32)

    out = jax.block_until_ready(global_layer_norm(x, gamma, beta))
    ref = global_layer_norm_ref(x, gamma, beta)
    assert out.shape == (B, C, F)
    assert jnp.allclose(out, ref, atol=1e-4, rtol=1e-4), "mismatch vs reference (single-tile)"

    # Second small case exercising the tiled + ragged-tail (masked) path.
    B2, C2, F2 = 2, 8, 320
    x2 = jax.random.normal(k2, (B2, C2, F2), dtype=jnp.float32)
    g2 = jnp.ones((C2,), jnp.float32) - 0.05 * jnp.arange(C2, dtype=jnp.float32)
    b2 = 0.02 * jnp.arange(C2, dtype=jnp.float32)
    out2 = jax.block_until_ready(global_layer_norm(x2, g2, b2, tf=128))
    ref2 = global_layer_norm_ref(x2, g2, b2)
    assert jnp.allclose(out2, ref2, atol=1e-4, rtol=1e-4), "mismatch vs reference (tiled/masked)"

    print("KERNEL_OK")
</pallas_src>

<mosaic_0001>
module attributes {stable_mosaic.version = 11 : i64} {
  func.func @_gln_kernel(%arg0: i32, %arg1: i32, %arg2: i32, %arg3: memref<1x4x16xf32, #tpu.memory_space<vmem>>, %arg4: memref<4x1xf32, #tpu.memory_space<vmem>>, %arg5: memref<4x1xf32, #tpu.memory_space<vmem>>, %arg6: memref<1x4x16xf32, #tpu.memory_space<vmem>>, %arg7: memref<1x1xf32, #tpu.memory_space<vmem>>, %arg8: memref<1x1xf32, #tpu.memory_space<vmem>>) attributes {dimension_semantics = [#tpu.dimension_semantics<parallel>, #tpu.dimension_semantics<arbitrary>, #tpu.dimension_semantics<arbitrary>], iteration_bounds = array<i64: 2, 2, 1>, scalar_prefetch = 0 : i64, scratch_operands = 2 : i64, tpu.core_type = #tpu.core_type<tc>, window_params = [{transform_indices = @transform_0, window_bounds = array<i64: 1, 4, 16>}, {pipeline_mode = #tpu.pipeline_mode<synchronous>, transform_indices = @transform_1, window_bounds = array<i64: 4, 1>}, {pipeline_mode = #tpu.pipeline_mode<synchronous>, transform_indices = @transform_2, window_bounds = array<i64: 4, 1>}, {transform_indices = @transform_3, window_bounds = array<i64: 1, 4, 16>}]} {
    %c0_i32 = arith.constant 0 : i32
    %0 = arith.cmpi eq, %arg1, %c0_i32 : i32
    %c0_i32_0 = arith.constant 0 : i32
    %1 = arith.cmpi eq, %arg2, %c0_i32_0 : i32
    %2 = arith.andi %0, %1 : i1
    %3 = arith.extui %2 : i1 to i32
    %c0_i32_1 = arith.constant 0 : i32
    %4 = arith.cmpi ne, %3, %c0_i32_1 : i32
    scf.if %4 {
      %cst = arith.constant 0.000000e+00 : f32
      %13 = vector.broadcast %cst : f32 to vector<1x1xf32>
      %c0_7 = arith.constant 0 : index
      %c0_8 = arith.constant 0 : index
      %14 = vector.load %arg7[%c0_7, %c0_8] : memref<1x1xf32, #tpu.memory_space<vmem>>, vector<1x1xf32>
      tpu.vector_store %arg7[%c0_7, %c0_8], %13 {strides = array<i32>} : memref<1x1xf32, #tpu.memory_space<vmem>>, vector<1x1xf32>,
      %cst_9 = arith.constant 0.000000e+00 : f32
      %15 = vector.broadcast %cst_9 : f32 to vector<1x1xf32>
      %c0_10 = arith.constant 0 : index
      %c0_11 = arith.constant 0 : index
      %16 = vector.load %arg8[%c0_10, %c0_11] : memref<1x1xf32, #tpu.memory_space<vmem>>, vector<1x1xf32>
      tpu.vector_store %arg8[%c0_10, %c0_11], %15 {strides = array<i32>} : memref<1x1xf32, #tpu.memory_space<vmem>>, vector<1x1xf32>,
    } else {
    }
    %c0 = arith.constant 0 : index
    %c0_2 = arith.constant 0 : index
    %c0_3 = arith.constant 0 : index
    %5 = vector.load %arg3[%c0, %c0_2, %c0_3] : memref<1x4x16xf32, #tpu.memory_space<vmem>>, vector<1x4x16xf32>
    %6 = vector.shape_cast %5 : vector<1x4x16xf32> to vector<4x16xf32>
    %c0_i32_4 = arith.constant 0 : i32
    %7 = arith.cmpi eq, %arg1, %c0_i32_4 : i32
    %8 = arith.extui %7 : i1 to i32
    %c0_i32_5 = arith.constant 0 : i32
    %9 = arith.cmpi ne, %8, %c0_i32_5 : i32
    scf.if %9 {
      %c0_7 = arith.constant 0 : index
      %c0_8 = arith.constant 0 : index
      %13 = vector.load %arg7[%c0_7, %c0_8] : memref<1x1xf32, #tpu.memory_space<vmem>>, vector<1x1xf32>
      %14 = vector.shape_cast %6 : vector<4x16xf32> to vector<1x4x16xf32>
      %cst = arith.constant dense<0.000000e+00> : vector<1xf32>
      %15 = vector.multi_reduction <add>, %14, %cst [1, 2] : vector<1x4x16xf32> to vector<1xf32>
      %16 = vector.shape_cast %15 : vector<1xf32> to vector<1x1x1xf32>
      %17 = vector.extract %16[0, 0, 0] : f32 from vector<1x1x1xf32>
      %18 = vector.broadcast %17 : f32 to vector<1x1xf32>
      %19 = arith.addf %13, %18 : vector<1x1xf32>
      %c0_9 = arith.constant 0 : index
      %c0_10 = arith.constant 0 : index
      %20 = vector.load %arg7[%c0_9, %c0_10] : memref<1x1xf32, #tpu.memory_space<vmem>>, vector<1x1xf32>
      tpu.vector_store %arg7[%c0_9, %c0_10], %19 {strides = array<i32>} : memref<1x1xf32, #tpu.memory_space<vmem>>, vector<1x1xf32>,
      %c0_11 = arith.constant 0 : index
      %c0_12 = arith.constant 0 : index
      %21 = vector.load %arg8[%c0_11, %c0_12] : memref<1x1xf32, #tpu.memory_space<vmem>>, vector<1x1xf32>
      %22 = arith.mulf %6, %6 : vector<4x16xf32>
      %23 = vector.shape_cast %22 : vector<4x16xf32> to vector<1x4x16xf32>
      %cst_13 = arith.constant dense<0.000000e+00> : vector<1xf32>
      %24 = vector.multi_reduction <add>, %23, %cst_13 [1, 2] : vector<1x4x16xf32> to vector<1xf32>
      %25 = vector.shape_cast %24 : vector<1xf32> to vector<1x1x1xf32>
      %26 = vector.extract %25[0, 0, 0] : f32 from vector<1x1x1xf32>
      %27 = vector.broadcast %26 : f32 to vector<1x1xf32>
      %28 = arith.addf %21, %27 : vector<1x1xf32>
      %c0_14 = arith.constant 0 : index
      %c0_15 = arith.constant 0 : index
      %29 = vector.load %arg8[%c0_14, %c0_15] : memref<1x1xf32, #tpu.memory_space<vmem>>, vector<1x1xf32>
      tpu.vector_store %arg8[%c0_14, %c0_15], %28 {strides = array<i32>} : memref<1x1xf32, #tpu.memory_space<vmem>>, vector<1x1xf32>,
    } else {
    }
    %c1_i32 = arith.constant 1 : i32
    %10 = arith.cmpi eq, %arg1, %c1_i32 : i32
    %11 = arith.extui %10 : i1 to i32
    %c0_i32_6 = arith.constant 0 : i32
    %12 = arith.cmpi ne, %11, %c0_i32_6 : i32
    scf.if %12 {
      %c0_7 = arith.constant 0 : index
      %c0_8 = arith.constant 0 : index
      %13 = vector.load %arg7[%c0_7, %c0_8] : memref<1x1xf32, #tpu.memory_space<vmem>>, vector<1x1xf32>
      %cst = arith.constant 1.562500e-02 : f32
      %14 = vector.broadcast %cst : f32 to vector<1x1xf32>
      %15 = arith.mulf %13, %14 : vector<1x1xf32>
      %c0_9 = arith.constant 0 : index
      %c0_10 = arith.constant 0 : index
      %16 = vector.load %arg8[%c0_9, %c0_10] : memref<1x1xf32, #tpu.memory_space<vmem>>, vector<1x1xf32>
      %cst_11 = arith.constant 1.562500e-02 : f32
      %17 = vector.broadcast %cst_11 : f32 to vector<1x1xf32>
      %18 = arith.mulf %16, %17 : vector<1x1xf32>
      %19 = arith.mulf %15, %15 : vector<1x1xf32>
      %20 = arith.subf %18, %19 : vector<1x1xf32>
      %cst_12 = arith.constant 9.99999974E-6 : f32
      %21 = vector.broadcast %cst_12 : f32 to vector<1x1xf32>
      %22 = arith.addf %20, %21 : vector<1x1xf32>
      %23 = math.rsqrt %22 : vector<1x1xf32>
      %24 = vector.broadcast %15 : vector<1x1xf32> to vector<4x16xf32>
      %25 = arith.subf %6, %24 : vector<4x16xf32>
      %26 = vector.broadcast %23 : vector<1x1xf32> to vector<4x16xf32>
      %27 = arith.mulf %25, %26 : vector<4x16xf32>
      %c0_13 = arith.constant 0 : index
      %c0_14 = arith.constant 0 : index
      %28 = vector.load %arg4[%c0_13, %c0_14] : memref<4x1xf32, #tpu.memory_space<vmem>>, vector<4x1xf32>
      %29 = vector.broadcast %28 : vector<4x1xf32> to vector<4x16xf32>
      %30 = arith.mulf %27, %29 : vector<4x16xf32>
      %c0_15 = arith.constant 0 : index
      %c0_16 = arith.constant 0 : index
      %31 = vector.load %arg5[%c0_15, %c0_16] : memref<4x1xf32, #tpu.memory_space<vmem>>, vector<4x1xf32>
      %32 = vector.broadcast %31 : vector<4x1xf32> to vector<4x16xf32>
      %33 = arith.addf %30, %32 : vector<4x16xf32>
      %c0_17 = arith.constant 0 : index
      %c0_18 = arith.constant 0 : index
      %c0_19 = arith.constant 0 : index
      %34 = vector.load %arg6[%c0_17, %c0_18, %c0_19] : memref<1x4x16xf32, #tpu.memory_space<vmem>>, vector<1x4x16xf32>
      %35 = vector.shape_cast %34 : vector<1x4x16xf32> to vector<4x16xf32>
      %36 = vector.shape_cast %33 : vector<4x16xf32> to vector<1x4x16xf32>
      tpu.vector_store %arg6[%c0_17, %c0_18, %c0_19], %36 {strides = array<i32>} : memref<1x4x16xf32, #tpu.memory_space<vmem>>, vector<1x4x16xf32>,
    } else {
    }
    return
  }
  func.func @transform_0(%arg0: i32, %arg1: i32, %arg2: i32) -> (i32, i32, i32) {
    %c0_i32 = arith.constant 0 : i32
    %c0_i32_0 = arith.constant 0 : i32
    return %arg0, %c0_i32, %arg2 : i32, i32, i32
  }
  func.func @transform_1(%arg0: i32, %arg1: i32, %arg2: i32) -> (i32, i32) {
    %c0_i32 = arith.constant 0 : i32
    %c0_i32_0 = arith.constant 0 : i32
    %c0_i32_1 = arith.constant 0 : i32
    return %c0_i32, %c0_i32_0 : i32, i32
  }
  func.func @transform_2(%arg0: i32, %arg1: i32, %arg2: i32) -> (i32, i32) {
    %c0_i32 = arith.constant 0 : i32
    %c0_i32_0 = arith.constant 0 : i32
    %c0_i32_1 = arith.constant 0 : i32
    return %c0_i32, %c0_i32_0 : i32, i32
  }
  func.func @transform_3(%arg0: i32, %arg1: i32, %arg2: i32) -> (i32, i32, i32) {
    %0 = arith.muli %arg1, %arg2 : i32
    %c0_i32 = arith.constant 0 : i32
    %c0_i32_0 = arith.constant 0 : i32
    return %arg0, %c0_i32, %0 : i32, i32, i32
  }
}

</mosaic_0001>

<bundles_post_ra>
// kernel: tpu_custom_call.1
= control target key start
LH: loop header
LB: loop body
LE: loop exit
PB: predicated region body
PF: predicated region fallthrough
CT: control target
= control target key end

     0   :  { %8 = vsyncpa [#allocation5], 0  ;;  %s744_s0 = inlined_call_operand.vmem [shape: f32[2,4,16], index: 0, kind: input, shape index: {}]   ;;  %s745_s1 = inlined_call_operand.vmem [shape: f32[4,1], index: 1, kind: input, shape index: {}]   ;;  %s746_s2 = inlined_call_operand.vmem [shape: f32[4,1], index: 2, kind: input, shape index: {}]   ;;  %s747_s3 = inlined_call_operand.hbm [shape: f32[2,4,16], index: 3, kind: output, shape index: {}]  }
   0x1   :  { %10 = vsyncpa [#allocation5 + $0x1], 0  ;;  %s599_s12 = smov 0   ;;  %s601_s13 = smov 0  }
   0x2   :  { %s603_s14 = smov 0   ;;  %s605_s15 = smov 0  }
   0x3   :  { %s607_s16 = smov 0   ;;  %s609_s17 = smov 0  }
   0x4   :  { %s611_s18 = smov 0   ;;  %s613_s19 = smov 0  }
   0x5 LB: > { %s386_s20 = sadd.s32 4294967295, %s574_s19   ;;  %s387_s21 = sadd.s32 4294967294, %s574_s19   ;;  %s574_s19 = sphi %s613_s19, %s16_s19   ;;  %s570_s18 = sphi %s611_s18, %s756_s18   ;;  %s566_s17 = sphi %s609_s17, %s755_s17   ;;  %s562_s16 = sphi %s607_s16, %s754_s16   ;;  %s558_s15 = sphi %s605_s15, %s753_s15   ;;  %s554_s14 = sphi %s603_s14, %s752_s14   ;;  %s550_s13 = sphi %s601_s13, %s751_s13   ;;  %s546_s12 = sphi %s599_s12, %s750_s12  }
   0x6   : > { %s31_s22 = sadd.s32 1, %s566_s17  ;;  %s35_s23 = sadd.s32 1, %s570_s18 }
   0x7   : > { %p33_p0 = scmp.ge.s32.totalorder %s31_s22, 2  ;;  %p126_p1 = scmp.ne.s32.totalorder %s554_s14, %s550_s13 }
   0x8   : > { %p127_p2 = scmp.eq.s32.totalorder %s386_s20, 3  ;;  %p132_p4 = scmp.ne.s32.totalorder %s550_s13, %s546_s12 }
   0x9   : > { %s758_s22 = smov (%p33_p0, %s31_s22), 0  ;;  %s760_s23 = smov (!%p33_p0, %s35_s23), %s570_s18 }
   0xa   : > { %p648_p3 = por %p127_p2, %p126_p1  ;;  %p37_p5 = scmp.ge.s32.totalorder %s760_s23, 2 }
   0xb   : > { %p133_p6 = scmp.eq.s32.totalorder %s387_s21, 3  ;;  %p390_p7 = scmp.ge.s32.totalorder %s574_s19, 1 }
   0xc   : > { %p167_p8 = scmp.lt.s32.totalorder %s574_s19, 5  ;;  %s762_s23 = smov (%p37_p5, %s760_s23), 0 }
   0xd   : > { %p658_p9 = por %p133_p6, %p132_p4  ;;  %s111_s26 = ssub.s32 %s570_s18, %s762_s23 }
   0xe   : > { %p168_p10 = pnand %p390_p7, %p167_p8  ;;  %s116_s27 = sadd.s32 1, %s554_s14 }
   0xf   : > { %p114_p11 = scmp.eq.s32.totalorder %s111_s26, 0  ;;  %s190_s29 = sand.u32 (!%p168_p10), 1, %s550_s13  }
  0x10   : > { %171 = sbr.rel (%p168_p10) target bundleno = 431 (0x1af), region = 32  ;;  %p193_p12 = scmp.lt.s32.totalorder (!%p168_p10), %s562_s16, 1 }
  0x11   : > { %s666_s28 = scalar_select %p114_p11, %s554_s14, %s116_s27  }
  0x12   : > { %s672_s30 = sshll.u32 (!%p168_p10), %s190_s29, 2  ;;  %p201_p13 = scmp.eq.s32.totalorder (!%p168_p10), %s558_s15, 0 }
  0x13   : > { %s192_s9 = scalar_lea.vmem (!%p168_p10), [#allocation4], %s672_s30 }
  0x15   : > { %s194_s4 = scalar_select %p193_p12, %s562_s16, 1  ;;  %vm207_vm0 = vcmask (%p201_p13), 0   ;;  %v576_v0 = vmov (%p201_p13), 0.0  }
  0x16   : > { %206 = sbr.rel (!%p201_p13) target bundleno = 27 (0x1b), region = 36  ;;  %208 = vst.msk [vmem:[#allocation2] sm:$0x1] (%p201_p13), %vm207_vm0, %v576_v0  ;;  %209 = vst.msk [vmem:[#allocation3] sm:$0x1] (%p201_p13), %vm207_vm0, %v576_v0 }
  0x17   : > { %s392_s5 = sshll.u32 %s194_s4, 2 }
  0x18   : > { %s199_s8 = scalar_lea.vmem %s744_s0, %s392_s5 }
  0x1b PF: > { %v680_v1 = vld [vmem:[%s199_s8] sm:$0xf]  ;;  %p394_p0 = scmp.ne.s32.totalorder %s558_s15, 0 }
  0x1d   : > { %213 = sbr.rel (%p394_p0) target bundleno = 244 (0xf4), region = 40 }
  0x22   : > { %vm215_vm1 = vcmask 125952   ;;  %v231_v2 = vmul.f32 %v680_v1, %v680_v1  ;;  %v214_v19 = vld [vmem:[#allocation2] sm:$0x1]  ;;  %vm228_vm2 = vcmask 0   ;;  %v230_v22 = vld [vmem:[#allocation3] sm:$0x1] }
  0x23   : > { %v216_v3 = vsel %vm215_vm1, %v680_v1, 0.0 }
  0x24   : > { %217 = vadd.xlane.f32.xlu0 %v216_v3  ;;  %v232_v4 = vsel %vm215_vm1, %v231_v2, 0.0 }
  0x28   : > { %233 = vadd.xlane.f32.xlu0 %v232_v4 }
  0xad   : > { %v218_v5 = vpop.xlane.xlu0 %217 }
  0xae   : > { %v219_v6 = vrot.slane %v218_v5, 4 }
  0xb0   : > { %v220_v7 = vadd.f32 %v219_v6, %v218_v5 }
  0xb1   : > { %v234_v8 = vpop.xlane.xlu0 %233 }
  0xb2   : > { %v221_v9 = vrot.slane %v220_v7, 2  ;;  %v235_v10 = vrot.slane %v234_v8, 4 }
  0xb4   : > { %v236_v11 = vadd.f32 %v235_v10, %v234_v8  ;;  %v222_v12 = vadd.f32 %v221_v9, %v220_v7 }
  0xb6   : > { %v237_v13 = vrot.slane %v236_v11, 2  ;;  %v223_v14 = vrot.slane %v222_v12, 1 }
  0xb8   : > { %v238_v15 = vadd.f32 %v237_v13, %v236_v11  ;;  %v224_v16 = vadd.f32 %v223_v14, %v222_v12 }
  0xba   : > { %401 = vpush %v224_v16  ;;  %v239_v17 = vrot.slane %v238_v15, 1 }
  0xbc   : > { %v240_v18 = vadd.f32 %v239_v17, %v238_v15 }
  0xbe   : > { %403 = vpush %v240_v18 }
  0xeb   : > { %s402_s10 = spop %401 }
  0xec   : > { %v226_v20 = vstv %s402_s10 }
  0xed   : > { %v227_v21 = vadd.f32 %v226_v20, %v214_v19 }
  0xef   : > { %229 = vst.msk [vmem:[#allocation2] sm:$0x1] %vm228_vm2, %v227_v21  ;;  %s404_s11 = spop %403 }
  0xf0   : > { %v242_v23 = vstv %s404_s11 }
  0xf1   : > { %v243_v24 = vadd.f32 %v242_v23, %v230_v22 }
  0xf3   : > { %244 = vst.msk [vmem:[#allocation3] sm:$0x1] %vm228_vm2, %v243_v24 }
  0xf4 PF: > { %p395_p1 = scmp.ne.s32.totalorder %s558_s15, 1 }
  0xf6   : > { %248 = sbr.rel (%p395_p1) target bundleno = 408 (0x198), region = 44 }
  0xfb   : > { %v277_v25 = vld [vmem:[%s745_s1] sm:$0xf]  ;;  %v258_v27 = vlaneseq  ;;  %v577_v28 = vmov 0   ;;  %vm291_vm3 = vcmask 125952  }
  0xfc   : > { %v249_v26 = vld [vmem:[#allocation2] sm:$0x1]  ;;  %479 = vset.pattern.permute.xlu1 %v577_v28  ;;  %478 = vset.pattern.permute.xlu0 %v577_v28  ;;  %v251_v30 = vld [vmem:[#allocation3] sm:$0x1] }
  0xfd   : > { %v250_v29 = vmul.f32 0.015625, %v249_v26  ;;  %280 = vperm.xlu1 %479, %v277_v25   ;;  %v252_v31 = vmul.f32 0.015625, %v251_v30  ;;  %v259_v32 = vshrl.u32 %v258_v27, 7  ;;  %v284_v34 = vld [vmem:[%s746_s2] sm:$0xf] }
  0xff   : > { %v253_v33 = vmul.f32 %v250_v29, %v250_v29  ;;  %v260_v35 = vsub.s32 0, %v259_v32 }
 0x101   : > { %v254_v36 = vsub.f32 %v252_v31, %v253_v33  ;;  %v261_v37 = vrot.slane %v250_v29, %v260_v35  ;;  %287 = vperm.xlu1 %479, %v284_v34  }
 0x103   : > { %v255_v38 = vadd.f32 1e-05, %v254_v36  ;;  %263 = vperm.xlu0 %478, %v261_v37  }
 0x105   : > { %480 = vrsqrt.f32 %v255_v38 }
 0x112   : > { %v481_v39 = vpop.eup %480 }
 0x113   : > { %v271_v40 = vrot.slane %v481_v39, %v260_v35 }
 0x115   : > { %273 = vperm.xlu0 %478, %v271_v40  }
 0x178   : > { %v281_v42 = vpop.permute.xlu1 %280 }
 0x17c   : > { %v288_v47 = vpop.permute.xlu1 %287 }
 0x17e   : > { %v264_v41 = vpop.permute.xlu0 %263 }
 0x17f   : > { %v266_v43 = vsub.f32 %v680_v1, %v264_v41 }
 0x190   : > { %v274_v44 = vpop.permute.xlu0 %273 }
 0x191   : > { %v276_v45 = vmul.f32 %v274_v44, %v266_v43 }
 0x193   : > { %v283_v46 = vmul.f32 %v281_v42, %v276_v45 }
 0x195   : > { %v290_v48 = vadd.f32 %v288_v47, %v283_v46 }
 0x197   : > { %292 = vst.msk [vmem:[%s192_s9] sm:$0xf] %vm291_vm3, %v290_v48 }
 0x198 PF: > { %s397_s15 = sshll.u32 %s562_s16, 6  ;;  %s309_s7 = sshll.u32 %s192_s9, 4  ;;  %s310_s7 = int_to_ptr.vmem [resolvable:$true] %s309_s7 }
 0x199   : > { %s307_s6 = scalar_lea.hbm %s747_s3, %s397_s15  ;;  %s294_s8 = scalar_lea.sflag [#allocation5], %s190_s29 }
 0x19a   : > { %s482_s10 = scalar_lea.vmem %s310_s7, 64  ;;  %s578_s11 = smov [#allocation4]  }
 0x19b   : > { %p483_p2 = scmp.ne.s32.totalorder %s310_s7, %s482_s10  ;;  %s486_s20 = sshll.u32 %s578_s11, 4  ;;  %s487_s20 = int_to_ptr.vmem [resolvable:$false] %s486_s20 }
 0x19c   : > { %s488_s21 = scalar_lea.vmem %s487_s20, 128  ;;  %p489_p6 = scmp.lt.s32.totalorder %s310_s7, %s487_s20 }
 0x19d   : > { %p484_p4 = pnand %p483_p2, %p648_p3  ;;  %p490_p7 = scmp.lt.s32.totalorder %s488_s21, %s482_s10 }
 0x19f   : > { %p485_p5 = pneg %p484_p4  ;;  %p491_p8 = por %p490_p7, %p489_p6 }
 0x1a1   : > { %p492_p10 = pnand %p491_p8, %p485_p5 }
 0x1a3   : > { %495 = shalt.err (!%p492_p10)
}
 0x1a4   : > { %s496_s16 = scalar_lea.hbm %s307_s6, 64  ;;  %s500_s9 = scalar_lea.hbm %s747_s3, 128 }
 0x1a5   : > { %p497_p11 = scmp.ne.s32.totalorder %s307_s6, %s496_s16  ;;  %p501_p0 = scmp.lt.s32.totalorder %s307_s6, %s747_s3 }
 0x1a6   : > { %p502_p1 = scmp.lt.s32.totalorder %s500_s9, %s496_s16 }
 0x1a7   : > { %p498_p12 = pnand %p497_p11, %p648_p3 }
 0x1a8   : > { %p503_p2 = por %p502_p1, %p501_p0 }
 0x1a9   : > { %p499_p13 = pneg %p498_p12 }
 0x1ab   : > { %p504_p4 = pnand %p503_p2, %p499_p13 }
 0x1ad   : > { %507 = shalt.err (!%p504_p4)
}
 0x1ae   : > { %405 = dma.vmem_to_hbm [thread:$0]  (%p648_p3), %s310_s7, 64, %s307_s6, %s294_s8  }
 0x1af PF: > { %p411_p5 = scmp.ge.s32.totalorder %s574_s19, 2  ;;  %s321_s15 = sand.u32 1, %s546_s12  }
 0x1b0   : > { %s322_s4 = scalar_lea.sflag [#allocation5], %s321_s15 }
 0x1b1   : > { %p408_p6 = pnand %p411_p5, %p658_p9 }
 0x1b3   : > { %p409_p7 = pneg %p408_p6 }
 0x1b5   : > { %541 = dma.done.wait (%p409_p7), %s322_s4, 64  }
 0x1b6   : > { %543 = vsyncadd (%p409_p7), %s322_s4, 4294967232  ;;  %s16_s19 = sadd.s32 1, %s574_s19   ;;  %s750_s12 = smov %s550_s13 }
 0x1b7   : > { %p13_p8 = scmp.ge.s32.totalorder %s16_s19, 6   ;;  %s751_s13 = smov %s554_s14 }
 0x1b8   : > { %s752_s14 = smov %s666_s28  ;;  %s753_s15 = smov %s566_s17 }
 0x1b9   : > { %s754_s16 = smov %s570_s18  ;;  %s755_s17 = smov %s758_s22 }
 0x1ba   : > { %s756_s18 = smov %s762_s23  ;;  %15 = sbr.rel (!%p13_p8) target bundleno = 5 (0x5), region = 79 }
 0x1bf   :  { %327 = vsyncpa [#allocation5], 1 }
 0x1c0   :  { %329 = vsyncpa [#allocation5 + $0x1], 1 }

</bundles_post_ra>
